<compile_context>
chip_gen: v7x
topology: tpu7x:2x2x1
jax: 0.10.0
libtpu: 0.0.40
codegen_flags: <defaults>
</compile_context>

<pallas_src>
import jax
import jax.numpy as jnp
from jax.experimental import pallas as pl
from jax.experimental.pallas import tpu as pltpu


# ---------------------------------------------------------------------------
# Tiling helpers
# ---------------------------------------------------------------------------
_MAX_TILE_DST = 512
_MAX_TILE_SRC = 512


def _pad_to(n, m):
    return ((n + m - 1) // m) * m


def _pick_tile(n, max_tile):
    # Small dims: use the whole (8-aligned) extent. Large dims: fixed tile that
    # is a multiple of (8, 128) and amortizes the per-grid-step overhead.
    if n <= max_tile:
        return _pad_to(n, 8)
    return max_tile


# ---------------------------------------------------------------------------
# Pallas kernel:  out = sum_r  dd_r * (A_r @ Hs_r)  + sum_r b_r
# ---------------------------------------------------------------------------
def _relation_sum(a_stack, h_stack, dd_stack, b_sum, flags, td, ts):
    """a_stack : [R, Ndp, Nsp] bf16  raw (self-looped) 0/1 adjacency, padded
       h_stack : [R, Nsp, Fp]  f32   D_src^-1/2-scaled  X_src @ W_r, padded
       dd_stack: [R, Ndp, 1]   f32   D_dst^-1/2 per relation
       b_sum   : [1, Fp]       f32   sum of per-relation biases
       flags   : [R*nd*ns]     i32   per-(r, dst_tile, src_tile) nonzero flag
       returns [Ndp, Fp] f32."""
    R, ndp, nsp = a_stack.shape
    fp = h_stack.shape[-1]
    nd = ndp // td
    ns = nsp // ts

    def kernel(flags_ref, a_ref, h_ref, dd_ref, b_ref, o_ref):
        d = pl.program_id(0)
        r = pl.program_id(1)
        s = pl.program_id(2)

        @pl.when((r == 0) & (s == 0))
        def _init():
            # Output tile is resident across the (r, s) reduction axes; seed it
            # with the pre-summed bias (no zero-fill, no per-step bias add).
            o_ref[...] = jnp.broadcast_to(b_ref[...], o_ref.shape)

        # Block-sparsity skip: all-zero adjacency tiles contribute nothing.
        @pl.when(flags_ref[(r * nd + d) * ns + s] > 0)
        def _acc():
            a = a_ref[0].astype(jnp.float32)        # bf16 0/1 -> exact f32
            part = jnp.dot(a, h_ref[0], preferred_element_type=jnp.float32)
            o_ref[...] += dd_ref[0] * part          # fused D_dst^-1/2 scaling

    return pl.pallas_call(
        kernel,
        out_shape=jax.ShapeDtypeStruct((ndp, fp), jnp.float32),
        grid_spec=pltpu.PrefetchScalarGridSpec(
            num_scalar_prefetch=1,
            grid=(nd, R, ns),
            in_specs=[
                pl.BlockSpec((1, td, ts), lambda d, r, s, fl: (r, d, s)),
                pl.BlockSpec((1, ts, fp), lambda d, r, s, fl: (r, s, 0)),
                pl.BlockSpec((1, td, 1), lambda d, r, s, fl: (r, d, 0)),
                pl.BlockSpec((1, fp), lambda d, r, s, fl: (0, 0)),
            ],
            out_specs=pl.BlockSpec((td, fp), lambda d, r, s, fl: (d, 0)),
        ),
        compiler_params=pltpu.CompilerParams(
            dimension_semantics=("parallel", "arbitrary", "arbitrary"),
            vmem_limit_bytes=32 * 1024 * 1024,
        ),
    )(flags, a_stack, h_stack, dd_stack, b_sum)


# ---------------------------------------------------------------------------
# Wrapper: per-relation GraphConv prep + per-dst-type stacking
# ---------------------------------------------------------------------------
def hetero_graph_conv(canonical_etypes, adjs, inputs, weights, biases,
                      aggregate="sum"):
    """Pallas-backed HeteroGraphConv forward (aggregate='sum').

    canonical_etypes: list of (stype, etype, dtype)
    adjs:    dict etype -> [N_dst, N_src] binary adjacency
    inputs:  dict ntype -> [N, F_in] features
    weights: dict etype -> [F_in, F_out]
    biases:  dict etype -> [F_out]
    Returns dict dtype -> [N_dst, F_out].
    """
    assert aggregate == "sum"  # TODO(synk): 'max'/'min'/'mean'/'stack' cross-relation aggregation

    per_dst = {}
    for (stype, etype, dtype) in canonical_etypes:
        if stype not in inputs or dtype not in inputs:
            continue
        adj = adjs[etype].astype(jnp.float32)
        if not bool(jnp.any(adj != 0)):            # rel_graph.num_edges() == 0
            continue
        if stype == dtype:                          # dgl.add_self_loop semantics
            adj = jnp.maximum(adj, jnp.eye(adj.shape[0], dtype=adj.dtype))
        deg_dst = jnp.maximum(jnp.sum(adj, axis=1), 1.0)
        deg_src = jnp.maximum(jnp.sum(adj, axis=0), 1.0)
        dd = jax.lax.rsqrt(deg_dst)                 # [n_dst]
        ds = jax.lax.rsqrt(deg_src)                 # [n_src]
        # Hoist the small per-relation X @ W out of the tiled A@H loop (XLA).
        h = inputs[stype].astype(jnp.float32) @ weights[etype].astype(jnp.float32)
        h = ds[:, None] * h                         # fused D_src^-1/2 scaling
        per_dst.setdefault(dtype, []).append(
            (adj, h, dd, biases[etype].astype(jnp.float32)))

    rsts = {}
    for dtype, rels in per_dst.items():
        n_dst = rels[0][0].shape[0]
        f_out = rels[0][1].shape[-1]
        n_src_max = max(rel[0].shape[1] for rel in rels)

        td = _pick_tile(n_dst, _MAX_TILE_DST)
        ts = _pick_tile(n_src_max, _MAX_TILE_SRC)
        ndp = _pad_to(n_dst, td)
        nsp = _pad_to(n_src_max, ts)
        fp = _pad_to(f_out, 128)                    # lane-dense output stores

        a_list, h_list, dd_list = [], [], []
        b_sum = jnp.zeros((f_out,), jnp.float32)
        for (adj, h, dd, b) in rels:
            nd_r, ns_r = adj.shape
            a_list.append(jnp.pad(adj, ((0, ndp - nd_r), (0, nsp - ns_r))))
            h_list.append(jnp.pad(h, ((0, nsp - ns_r), (0, fp - f_out))))
            dd_list.append(jnp.pad(dd, (0, ndp - nd_r)))
            b_sum = b_sum + b

        a_f32 = jnp.stack(a_list, axis=0)
        a_stack = a_f32.astype(jnp.bfloat16)        # 0/1 -> exact in bf16
        h_stack = jnp.stack(h_list, axis=0)
        dd_stack = jnp.stack(dd_list, axis=0)[..., None]
        b_pad = jnp.pad(b_sum, (0, fp - f_out))[None, :]

        # per-(relation, dst_tile, src_tile) occupancy flags for sparsity skip
        R = len(rels)
        nd, ns = ndp // td, nsp // ts
        blk = a_f32.reshape(R, nd, td, ns, ts)
        flags = (jnp.sum(blk, axis=(2, 4)) > 0).astype(jnp.int32).reshape(-1)

        out = _relation_sum(a_stack, h_stack, dd_stack, b_pad, flags, td, ts)
        rsts[dtype] = out[:n_dst, :f_out]
    return rsts


# ---------------------------------------------------------------------------
# Plain-JAX reference mirroring the PyTorch forward with sum aggregation
# ---------------------------------------------------------------------------
def _reference(canonical_etypes, adjs, inputs, weights, biases):
    outputs = {}
    for (stype, etype, dtype) in canonical_etypes:
        if stype not in inputs or dtype not in inputs:
            continue
        adj = adjs[etype].astype(jnp.float32)
        if not bool(jnp.any(adj != 0)):
            continue
        if stype == dtype:
            adj = jnp.maximum(adj, jnp.eye(adj.shape[0], dtype=adj.dtype))
        deg_dst = jnp.maximum(jnp.sum(adj, axis=1), 1.0)
        deg_src = jnp.maximum(jnp.sum(adj, axis=0), 1.0)
        a_norm = adj * (deg_dst[:, None] ** -0.5) * (deg_src[None, :] ** -0.5)
        h = a_norm @ (inputs[stype].astype(jnp.float32) @ weights[etype]) + biases[etype]
        outputs.setdefault(dtype, []).append(h)
    return {d: jnp.sum(jnp.stack(v, axis=0), axis=0) for d, v in outputs.items()}


if __name__ == "__main__":
    key = jax.random.PRNGKey(0)
    N_USER, N_ITEM, F_IN, F_OUT = 16, 24, 32, 32

    # synthetic heterograph: 2 node types (different sizes), 3 canonical etypes
    canonical_etypes = [
        ("user", "follows", "user"),
        ("item", "sells", "user"),
        ("user", "buys", "item"),
    ]

    keys = jax.random.split(key, 10)
    inputs = {
        "user": jax.random.normal(keys[0], (N_USER, F_IN), jnp.float32),
        "item": jax.random.normal(keys[1], (N_ITEM, F_IN), jnp.float32),
    }
    adjs = {  # [N_dst, N_src] binary adjacency per relation
        "follows": (jax.random.uniform(keys[2], (N_USER, N_USER)) < 0.3).astype(jnp.float32),
        "sells":   (jax.random.uniform(keys[3], (N_USER, N_ITEM)) < 0.3).astype(jnp.float32),
        "buys":    (jax.random.uniform(keys[4], (N_ITEM, N_USER)) < 0.3).astype(jnp.float32),
    }
    scale = (2.0 / (F_IN + F_OUT)) ** 0.5
    weights = {
        "follows": scale * jax.random.normal(keys[5], (F_IN, F_OUT), jnp.float32),
        "sells":   scale * jax.random.normal(keys[6], (F_IN, F_OUT), jnp.float32),
        "buys":    scale * jax.random.normal(keys[7], (F_IN, F_OUT), jnp.float32),
    }
    biases = {
        "follows": jnp.zeros((F_OUT,), jnp.float32),
        "sells":   0.01 * jax.random.normal(keys[8], (F_OUT,), jnp.float32),
        "buys":    0.01 * jax.random.normal(keys[9], (F_OUT,), jnp.float32),
    }

    out = hetero_graph_conv(canonical_etypes, adjs, inputs, weights, biases,
                            aggregate="sum")
    out = jax.tree_util.tree_map(jax.block_until_ready, out)

    ref = _reference(canonical_etypes, adjs, inputs, weights, biases)
    for nty in ref:
        assert out[nty].shape == ref[nty].shape, (nty, out[nty].shape, ref[nty].shape)
        assert jnp.allclose(out[nty], ref[nty], atol=1e-4, rtol=1e-4), nty

    print("KERNEL_OK")
</pallas_src>

<mosaic_0001>
module attributes {stable_mosaic.version = 11 : i64} {
  func.func @kernel(%arg0: i32, %arg1: i32, %arg2: i32, %arg3: memref<2xi32, #tpu.memory_space<smem>>, %arg4: memref<1x16x24xbf16, #tpu.memory_space<vmem>>, %arg5: memref<1x24x128xf32, #tpu.memory_space<vmem>>, %arg6: memref<1x16x1xf32, #tpu.memory_space<vmem>>, %arg7: memref<1x128xf32, #tpu.memory_space<vmem>>, %arg8: memref<16x128xf32, #tpu.memory_space<vmem>>) attributes {dimension_semantics = [#tpu.dimension_semantics<parallel>, #tpu.dimension_semantics<arbitrary>, #tpu.dimension_semantics<arbitrary>], iteration_bounds = array<i64: 1, 2, 1>, scalar_prefetch = 1 : i64, scratch_operands = 0 : i64, tpu.core_type = #tpu.core_type<tc>, window_params = [{transform_indices = @transform_0, window_bounds = array<i64: 1, 16, 24>}, {transform_indices = @transform_1, window_bounds = array<i64: 1, 24, 128>}, {transform_indices = @transform_2, window_bounds = array<i64: 1, 16, 1>}, {pipeline_mode = #tpu.pipeline_mode<synchronous>, transform_indices = @transform_3, window_bounds = array<i64: 1, 128>}, {transform_indices = @transform_4, window_bounds = array<i64: 16, 128>}]} {
    %c0_i32 = arith.constant 0 : i32
    %0 = arith.cmpi eq, %arg1, %c0_i32 : i32
    %c0_i32_0 = arith.constant 0 : i32
    %1 = arith.cmpi eq, %arg2, %c0_i32_0 : i32
    %2 = arith.andi %0, %1 : i1
    %3 = arith.extui %2 : i1 to i32
    %c0_i32_1 = arith.constant 0 : i32
    %4 = arith.cmpi ne, %3, %c0_i32_1 : i32
    scf.if %4 {
      %c0 = arith.constant 0 : index
      %c0_5 = arith.constant 0 : index
      %14 = vector.load %arg7[%c0, %c0_5] : memref<1x128xf32, #tpu.memory_space<vmem>>, vector<1x128xf32>
      %15 = vector.shape_cast %14 : vector<1x128xf32> to vector<1x128xf32>
      %16 = vector.broadcast %15 : vector<1x128xf32> to vector<16x128xf32>
      %c0_6 = arith.constant 0 : index
      %c0_7 = arith.constant 0 : index
      %17 = vector.load %arg8[%c0_6, %c0_7] : memref<16x128xf32, #tpu.memory_space<vmem>>, vector<16x128xf32>
      tpu.vector_store %arg8[%c0_6, %c0_7], %16 {strides = array<i32>} : memref<16x128xf32, #tpu.memory_space<vmem>>, vector<16x128xf32>,
    } else {
    }
    %c1_i32 = arith.constant 1 : i32
    %5 = arith.muli %arg1, %c1_i32 : i32
    %6 = arith.addi %5, %arg0 : i32
    %c1_i32_2 = arith.constant 1 : i32
    %7 = arith.muli %6, %c1_i32_2 : i32
    %8 = arith.addi %7, %arg2 : i32
    %9 = arith.index_cast %8 : i32 to index
    %10 = memref.load %arg3[%9] : memref<2xi32, #tpu.memory_space<smem>>
    %c0_i32_3 = arith.constant 0 : i32
    %11 = arith.cmpi sgt, %10, %c0_i32_3 : i32
    %12 = arith.extui %11 : i1 to i32
    %c0_i32_4 = arith.constant 0 : i32
    %13 = arith.cmpi ne, %12, %c0_i32_4 : i32
    scf.if %13 {
      %c0 = arith.constant 0 : index
      %c0_5 = arith.constant 0 : index
      %c0_6 = arith.constant 0 : index
      %14 = vector.load %arg4[%c0, %c0_5, %c0_6] : memref<1x16x24xbf16, #tpu.memory_space<vmem>>, vector<1x16x24xbf16>
      %15 = vector.shape_cast %14 : vector<1x16x24xbf16> to vector<16x24xbf16>
      %16 = arith.extf %15 : vector<16x24xbf16> to vector<16x24xf32>
      %c0_7 = arith.constant 0 : index
      %c0_8 = arith.constant 0 : index
      %c0_9 = arith.constant 0 : index
      %17 = vector.load %arg5[%c0_7, %c0_8, %c0_9] : memref<1x24x128xf32, #tpu.memory_space<vmem>>, vector<1x24x128xf32>
      %18 = vector.shape_cast %17 : vector<1x24x128xf32> to vector<24x128xf32>
      %cst = arith.constant dense<0.000000e+00> : vector<16x128xf32>
      %19 = tpu.matmul %16, %18, %cst {dimension_numbers = #tpu.dot_dimension_numbers<[1], [0], [0], [1], [0, 0, 1, 1], [], []>} : vector<16x24xf32>, vector<24x128xf32>, vector<16x128xf32> -> vector<16x128xf32>
      %c0_10 = arith.constant 0 : index
      %c0_11 = arith.constant 0 : index
      %20 = vector.load %arg8[%c0_10, %c0_11] : memref<16x128xf32, #tpu.memory_space<vmem>>, vector<16x128xf32>
      %c0_12 = arith.constant 0 : index
      %c0_13 = arith.constant 0 : index
      %c0_14 = arith.constant 0 : index
      %21 = vector.load %arg6[%c0_12, %c0_13, %c0_14] : memref<1x16x1xf32, #tpu.memory_space<vmem>>, vector<1x16x1xf32>
      %22 = vector.shape_cast %21 : vector<1x16x1xf32> to vector<16x1xf32>
      %23 = vector.broadcast %22 : vector<16x1xf32> to vector<16x128xf32>
      %24 = arith.mulf %23, %19 : vector<16x128xf32>
      %25 = arith.addf %20, %24 : vector<16x128xf32>
      %c0_15 = arith.constant 0 : index
      %c0_16 = arith.constant 0 : index
      %26 = vector.load %arg8[%c0_15, %c0_16] : memref<16x128xf32, #tpu.memory_space<vmem>>, vector<16x128xf32>
      tpu.vector_store %arg8[%c0_15, %c0_16], %25 {strides = array<i32>} : memref<16x128xf32, #tpu.memory_space<vmem>>, vector<16x128xf32>,
    } else {
    }
    return
  }
  func.func @transform_0(%arg0: i32, %arg1: i32, %arg2: i32, %arg3: memref<2xi32, #tpu.memory_space<smem>>) -> (i32, i32, i32) {
    %c0_i32 = arith.constant 0 : i32
    return %arg1, %arg0, %arg2 : i32, i32, i32
  }
  func.func @transform_1(%arg0: i32, %arg1: i32, %arg2: i32, %arg3: memref<2xi32, #tpu.memory_space<smem>>) -> (i32, i32, i32) {
    %c0_i32 = arith.constant 0 : i32
    %c0_i32_0 = arith.constant 0 : i32
    return %arg1, %arg2, %c0_i32 : i32, i32, i32
  }
  func.func @transform_2(%arg0: i32, %arg1: i32, %arg2: i32, %arg3: memref<2xi32, #tpu.memory_space<smem>>) -> (i32, i32, i32) {
    %c0_i32 = arith.constant 0 : i32
    %c0_i32_0 = arith.constant 0 : i32
    return %arg1, %arg0, %c0_i32 : i32, i32, i32
  }
  func.func @transform_3(%arg0: i32, %arg1: i32, %arg2: i32, %arg3: memref<2xi32, #tpu.memory_space<smem>>) -> (i32, i32) {
    %c0_i32 = arith.constant 0 : i32
    %c0_i32_0 = arith.constant 0 : i32
    %c0_i32_1 = arith.constant 0 : i32
    return %c0_i32, %c0_i32_0 : i32, i32
  }
  func.func @transform_4(%arg0: i32, %arg1: i32, %arg2: i32, %arg3: memref<2xi32, #tpu.memory_space<smem>>) -> (i32, i32) {
    %c0_i32 = arith.constant 0 : i32
    %c0_i32_0 = arith.constant 0 : i32
    return %arg0, %c0_i32 : i32, i32
  }
}

</mosaic_0001>

<bundles_post_ra>
// kernel: tpu_custom_call.1
= control target key start
LH: loop header
LB: loop body
LE: loop exit
PB: predicated region body
PF: predicated region fallthrough
CT: control target
= control target key end

     0   :  { %s1011_s0 = inlined_call_operand.vmem [shape: s32[2], index: 0, kind: input, shape index: {}]   ;;  %s1012_s1 = inlined_call_operand.vmem [shape: bf16[2,16,24], index: 1, kind: input, shape index: {}]   ;;  %s1013_s2 = inlined_call_operand.hbm [shape: f32[2,24,128], index: 2, kind: input, shape index: {}]   ;;  %s1014_s3 = inlined_call_operand.vmem [shape: f32[2,16,1], index: 3, kind: input, shape index: {}]   ;;  %s1015_s4 = inlined_call_operand.vmem [shape: f32[1,128], index: 4, kind: input, shape index: {}]   ;;  %s1016_s5 = inlined_call_operand.hbm [shape: f32[16,128], index: 5, kind: output, shape index: {}]  }
   0x1   :  { %s10_s20 = sshll.u32 %s1011_s0, 4  ;;  %s11_s20 = int_to_ptr.vmem [resolvable:$true] %s10_s20 }
   0x2   :  { %s688_s21 = scalar_lea.vmem %s11_s20, 16  ;;  %p693_p1 = scmp.lt.s32.totalorder %s11_s20, %s11_s20 }
   0x3   :  { %p689_p0 = scmp.ne.s32.totalorder %s11_s20, %s688_s21  ;;  %p694_p2 = scmp.lt.s32.totalorder %s688_s21, %s688_s21 }
   0x5   :  { %p695_p3 = por %p694_p2, %p693_p1 }
   0x7   :  { %p696_p4 = pnand %p695_p3, %p689_p0 }
   0x9   :  { %699 = shalt.err (!%p696_p4)  }
   0xa   :  { %s814_s22 = smov [#allocation3]  }
   0xb   :  { %13 = dma.vmem_to_smem %s11_s20, 16, %s814_s22, [#allocation2] }
   0xc   :  { %780 = dma.done.wait [#allocation2], 16 }
   0xd   :  { %781 = vsyncadd [#allocation2], 4294967280 }
   0xe   :  { %15 = sfence }
   0xf   :  { %16 = vsyncpa [#allocation5], 0 }
  0x10   :  { %18 = vsyncpa [#allocation5 + $0x1], 0 }
  0x11   :  { %19 = vsyncpa [#allocation6], 0  ;;  %s855_s23 = smov 0   ;;  %s857_s24 = smov 0  }
  0x12   :  { %s859_s0 = smov 0   ;;  %s861_s25 = smov 0  }
  0x13   :  { %s863_s26 = smov 0   ;;  %s865_s27 = smov 0  }
  0x14 LB: > { %s573_s28 = sadd.s32 4294967295, %s812_s27   ;;  %s40_s29 = sadd.s32 1, %s808_s26  ;;  %s812_s27 = sphi %s865_s27, %s25_s27   ;;  %s808_s26 = sphi %s863_s26, %s1024_s26   ;;  %s804_s25 = sphi %s861_s25, %s1023_s25   ;;  %s800_s0 = sphi %s859_s0, %s1022_s0   ;;  %s796_s24 = sphi %s857_s24, %s1021_s24   ;;  %s792_s23 = sphi %s855_s23, %s1020_s23  }
  0x15   : > { %p42_p5 = scmp.ge.s32.totalorder %s40_s29, 2  ;;  %s83_s30 = sadd.s32 1, %s800_s0 }
  0x16   : > { %p90_p6 = scmp.ne.s32.totalorder %s800_s0, %s796_s24  ;;  %p91_p7 = scmp.eq.s32.totalorder %s812_s27, 0 }
  0x17   : > { %s1026_s29 = smov (%p42_p5, %s40_s29), 0  ;;  %p96_p9 = scmp.ne.s32.totalorder %s796_s24, %s792_s23 }
  0x18   : > { %p92_p8 = por %p91_p7, %p90_p6  ;;  %s78_s6 = ssub.s32 %s808_s26, %s1026_s29 }
  0x19   : > { %p97_p10 = scmp.eq.s32.totalorder %s573_s28, 0  ;;  %p81_p11 = scmp.eq.s32.totalorder %s78_s6, 0 }
  0x1a   : > { %p629_p13 = scmp.lt.s32.totalorder %s812_s27, 2  ;;  %s214_s9 = sand.u32 1, %s800_s0  }
  0x1b   : > { %p896_p12 = por %p97_p10, %p96_p9  ;;  %s617_s10 = smul.u32 384, %s808_s26 }
  0x1c   : > { %s902_s8 = scalar_select %p81_p11, %s800_s0, %s83_s30  }
  0x1d   : > { %s616_s11 = smul.u32 24, %s214_s9  ;;  %s909_s14 = scalar_lea.hbm %s1013_s2, %s617_s10 }
  0x1e   : > { %p911_p0 = pnand %p629_p13, %p92_p8  ;;  %s917_s18 = scalar_lea.sflag [#allocation5], %s214_s9 }
  0x1f   : > { %s218_s16 = scalar_lea.vmem [#allocation4], %s616_s11  ;;  %s700_s19 = scalar_lea.hbm %s909_s14, 384 }
  0x20   : > { %s227_s17 = sshll.u32 %s218_s16, 4  ;;  %p701_p1 = scmp.ne.s32.totalorder %s909_s14, %s700_s19  ;;  %s915_s17 = int_to_ptr.vmem [resolvable:$true] %s227_s17 }
  0x21   : > { %p702_p2 = pneg %p911_p0  ;;  %s705_s22 = scalar_lea.hbm %s1013_s2, 768 }
  0x22   : > { %p706_p5 = scmp.lt.u32.totalorder %s909_s14, %s1013_s2  ;;  %p707_p6 = scmp.lt.u32.totalorder %s705_s22, %s700_s19 }
  0x23   : > { %p703_p3 = pnand %p702_p2, %p701_p1  ;;  %p709_p8 = scmp.lt.u32.totalorder %s700_s19, %s909_s14 }
  0x24   : > { %p708_p7 = por %p707_p6, %p706_p5 }
  0x25   : > { %p704_p4 = pneg %p703_p3 }
  0x26   : > { %p710_p9 = por %p709_p8, %p708_p7 }
  0x28   : > { %p711_p10 = pnand %p710_p9, %p704_p4 }
  0x2a   : > { %714 = shalt.err (!%p711_p10)
}
  0x2b   : > { %s715_s6 = scalar_lea.vmem %s915_s17, 384  ;;  %s815_s9 = smov [#allocation4]  }
  0x2c   : > { %p716_p11 = scmp.ne.s32.totalorder %s915_s17, %s715_s6  ;;  %s720_s10 = sshll.u32 %s815_s9, 4  ;;  %s721_s10 = int_to_ptr.vmem [resolvable:$false] %s720_s10 }
  0x2d   : > { %s722_s11 = scalar_lea.vmem %s721_s10, 768  ;;  %p723_p3 = scmp.lt.s32.totalorder %s915_s17, %s721_s10 }
  0x2e   : > { %p718_p13 = pnand %p716_p11, %p702_p2  ;;  %p724_p5 = scmp.lt.s32.totalorder %s722_s11, %s715_s6 }
  0x30   : > { %p719_p1 = pneg %p718_p13  ;;  %p725_p6 = por %p724_p5, %p723_p3 }
  0x32   : > { %p726_p7 = pnand %p725_p6, %p719_p1 }
  0x34   : > { %729 = shalt.err (!%p726_p7)
}
  0x35   : > { %s816_s12 = smov 128   ;;  %s817_s13 = smov 8  }
  0x36   : > { %628 = dma.hbm_to_vmem [thread:$0]  (!%p911_p0), %s909_s14, 384, %s915_s17, %s917_s18, %s816_s12, %s816_s12, %s817_s13  }
  0x37   : > { %p577_p2 = scmp.ge.s32.totalorder %s812_s27, 1  ;;  %p248_p4 = scmp.lt.s32.totalorder %s812_s27, 3 }
  0x39   : > { %p249_p8 = pnand %p577_p2, %p248_p4 }
  0x3a   : > { %s254_s16 = sand.u32 (!%p249_p8), 1, %s796_s24  }
  0x3b   : > { %252 = sbr.rel (%p249_p8) target bundleno = 337 (0x151), region = 36  ;;  %s255_s20 = scalar_lea.sflag (!%p249_p8), [#allocation5], %s254_s16 }
  0x3c   : > { %s618_s19 = smul.u32 (!%p249_p8), 24, %s254_s16 }
  0x3e   : > { %s258_s21 = scalar_lea.vmem (!%p249_p8), [#allocation4], %s618_s19 }
  0x42   : > { %783 = dma.done.wait (%p896_p12), %s255_s20, 384  }
  0x43   : > { %785 = vsyncadd (%p896_p12), %s255_s20, 4294966912  ;;  %p300_p9 = scmp.lt.s32.totalorder %s804_s25, 1  ;;  %p324_p0 = scmp.eq.s32.totalorder %s804_s25, 0 }
  0x44   : > { %v583_v0 = vld [vmem:[%s1015_s4] ss:$0 sm:$0xff] (%p324_p0) }
  0x45   : > { %s301_s14 = scalar_select %p300_p9, %s804_s25, 1 }
  0x46   : > { %329 = sbr.rel (!%p324_p0) target bundleno = 77 (0x4d), region = 44  ;;  %337 = vst [vmem:[#allocation7] sm:$0xff] (%p324_p0), %v583_v0  ;;  %338 = vst [vmem:[#allocation7 + $0x8] sm:$0xff] (%p324_p0), %v583_v0 }
  0x47   : > { %s591_s15 = sshll.u32 %s301_s14, 3  ;;  %s592_s17 = sshll.u32 %s301_s14, 4 }
  0x48   : > { %s310_s23 = scalar_lea.vmem %s1012_s1, %s591_s15  ;;  %s321_s9 = scalar_lea.vmem %s1014_s3, %s592_s17 }
  0x4d PF: > { %s341_s11 = sld [smem:[#allocation3 + %s804_s25]] }
  0x53   : > { %p584_p12 = scmp.le.s32.totalorder %s341_s11, 0 }
  0x54   : > { %v350_v1 = vld [vmem:[%s258_s21] sm:$0xff] (!%p584_p12)  ;;  %v351_v2 = vld [vmem:[%s258_s21 + $0x8] sm:$0xff] (!%p584_p12)  ;;  %vm353_vm0 = vcmask (!%p584_p12), 195584   ;;  %v818_v5 = vmov (!%p584_p12), 0   ;;  %v352_v7 = vld [vmem:[%s258_s21 + $0x10] sm:$0xff] (!%p584_p12) }
  0x55   : > { %345 = sbr.rel (%p584_p12) target bundleno = 311 (0x137), region = 48  ;;  %v612_v3 = vpack.c.bf16 (!%p584_p12), %v351_v2, %v350_v1  ;;  %v595_v4 = vld [vmem:[%s310_s23] sm:$0xff] (!%p584_p12)   ;;  %687 = vset.pattern.permute.xlu0 (!%p584_p12), %v818_v5  ;;  %v438_v9 = vld [vmem:[%s321_s9 + $0x8] sm:$0xff] (!%p584_p12)  ;;  %v436_v14 = vld [vmem:[#allocation7 + $0x8] sm:$0xff] (!%p584_p12) }
  0x56   : > { %v437_v6 = vld [vmem:[%s321_s9] sm:$0xff] (!%p584_p12)  ;;  %v596_v8 = vunpack.c.l.bf16 (!%p584_p12), %v595_v4  ;;  %v597_v10 = vunpack.c.h.bf16 (!%p584_p12), %v595_v4  ;;  %v435_v17 = vld [vmem:[#allocation7] sm:$0xff] (!%p584_p12) }
  0x57   : > { %441 = vperm.xlu0 (!%p584_p12), %687, %v437_v6   ;;  %613 = vmatprep.subr.bf16.mxu0 (!%p584_p12), %v612_v3 }
  0x58   : > { %615 = vmatpush3.bf16.msra.mxu0 (!%p584_p12), %v612_v3  ;;  %609 = vmatprep.mubr.msk.f32.mxu0 (!%p584_p12), %vm353_vm0, %v596_v8 }
  0x59   : > { %607 = vmatprep.subr.mxu0 (!%p584_p12), %v352_v7 }
  0x5b   : > { %446 = vperm.xlu0 (!%p584_p12), %687, %v438_v9  }
  0x5c   : > { %608 = vmatpush3.msra.mxu0 %v352_v7 }
  0x5d   : > { %610 = vmatmul.mubr.msk.f32.vlgmr.msra.gmra.mrb[0].mxu0 %vm353_vm0, %v597_v10 }
  0xd6   : > { %v442_v11 = vpop.permute.xlu0 %441 }
  0xda   : > { %v447_v12 = vpop.permute.xlu0 %446 }
 0x130   : > { %v611_v13 = vpop.f32.mrb[0].mxu0 }
 0x131   : > { %v450_v15 = vmul.f32 %v611_v13, %v447_v12  ;;  %v426_v16 = vpop.f32.mrb[1].mxu0 }
 0x132   : > { %v449_v18 = vmul.f32 %v442_v11, %v426_v16 }
 0x133   : > { %v452_v19 = vadd.f32 %v450_v15, %v436_v14 }
 0x134   : > { %v451_v20 = vadd.f32 %v449_v18, %v435_v17 }
 0x135   : > { %454 = vst [vmem:[#allocation7 + $0x8] sm:$0xff] %v452_v19 }
 0x136   : > { %453 = vst [vmem:[#allocation7] sm:$0xff] %v451_v20 }
 0x137 PF: > { %p967_p10 = scmp.eq.s32.totalorder %s573_s28, 1  ;;  %s819_s12 = smov [#allocation7]  }
 0x138   : > { %s464_s13 = sshll.u32 %s819_s12, 4  ;;  %s465_s13 = int_to_ptr.vmem [resolvable:$true] %s464_s13 }
 0x139   : > { %s730_s16 = scalar_lea.vmem %s465_s13, 256  ;;  %p737_p3 = scmp.lt.s32.totalorder %s465_s13, %s465_s13 }
 0x13a   : > { %p731_p11 = scmp.ne.s32.totalorder %s465_s13, %s730_s16  ;;  %p738_p5 = scmp.lt.s32.totalorder %s730_s16, %s730_s16 }
 0x13c   : > { %p732_p13 = pnand %p731_p11, %p967_p10  ;;  %p739_p6 = por %p738_p5, %p737_p3 }
 0x13e   : > { %p733_p1 = pneg %p732_p13 }
 0x140   : > { %p740_p7 = pnand %p739_p6, %p733_p1 }
 0x142   : > { %743 = shalt.err (!%p740_p7)
}
 0x143   : > { %s744_s28 = scalar_lea.hbm %s1016_s5, 256 }
 0x144   : > { %p745_p2 = scmp.ne.s32.totalorder %s1016_s5, %s744_s28  ;;  %p750_p9 = scmp.lt.u32.totalorder %s744_s28, %s1016_s5 }
 0x146   : > { %p746_p4 = pnand %p745_p2, %p967_p10 }
 0x148   : > { %p747_p8 = pneg %p746_p4 }
 0x14a   : > { %p752_p0 = pnand %p750_p9, %p747_p8 }
 0x14c   : > { %755 = shalt.err (!%p752_p0)
}
 0x14d   : > { %s820_s18 = smov 128   ;;  %s821_s22 = smov 8  }
 0x14e   : > { %622 = dma.vmem_to_hbm [thread:$0]  (%p967_p10), %s465_s13, 256, %s1016_s5, [#allocation6], %s820_s18, %s820_s18, %s821_s22  }
 0x14f   : > { %787 = dma.done.wait (%p967_p10), [#allocation6], 256  }
 0x150   : > { %789 = vsyncadd (%p967_p10), [#allocation6], 4294967040 }
 0x151 PF: > { %s25_s27 = sadd.s32 1, %s812_s27   ;;  %s1020_s23 = smov %s796_s24 }
 0x152   : > { %p22_p12 = scmp.ge.s32.totalorder %s25_s27, 4   ;;  %s1021_s24 = smov %s800_s0 }
 0x153   : > { %s1022_s0 = smov %s902_s8  ;;  %s1023_s25 = smov %s808_s26 }
 0x154   : > { %s1024_s26 = smov %s1026_s29  ;;  %24 = sbr.rel (!%p22_p12) target bundleno = 20 (0x14), region = 88 }
 0x15b   :  { %480 = vsyncpa [#allocation5], 1 }
 0x15c   :  { %482 = vsyncpa [#allocation5 + $0x1], 1 }
 0x15d   :  { %483 = vsyncpa [#allocation6], 1 }
 0x15e   :  { %485 = vsyncpa [#allocation6 + $0x1], 1 }

</bundles_post_ra>
